<compile_context>
chip_gen: v5e
topology: v5e:2x2
jax: 0.10.0
libtpu: 0.0.40
codegen_flags: <defaults>
</compile_context>

<pallas_src>
import functools

import jax
import jax.numpy as jnp
from jax.experimental import pallas as pl
from jax.experimental.pallas import tpu as pltpu


def _patch_proj_kernel(p_ref, w_ref, b_ref, o_ref):
    # MXU matmul with f32 accumulation, then add bias (broadcast over rows).
    acc = jnp.dot(p_ref[...], w_ref[...], preferred_element_type=jnp.float32)
    o_ref[...] = (acc + b_ref[...].astype(jnp.float32)).astype(o_ref.dtype)


def _patch_proj(patches, weight_2d, bias_2d, *, out_dtype=jnp.float32, tm=2048):
    """patches: (M, K), weight_2d: (K, E), bias_2d: (1, E) -> (M, E)."""
    M, K = patches.shape
    _, E = weight_2d.shape

    # Tile over M; clamp the tile to M for small problems. TM is either a
    # multiple of 8 (2048) or equal to the full M dim, so the block shape is
    # always legal; a trailing partial block (M % TM != 0) is handled by Pallas
    # (out-of-range rows are never written back).
    TM = min(tm, M)
    grid_m = pl.cdiv(M, TM)

    return pl.pallas_call(
        _patch_proj_kernel,
        out_shape=jax.ShapeDtypeStruct((M, E), out_dtype),
        grid_spec=pltpu.PrefetchScalarGridSpec(
            num_scalar_prefetch=0,
            grid=(grid_m,),
            in_specs=[
                pl.BlockSpec((TM, K), lambda i: (i, 0)),   # streamed, double-buffered
                pl.BlockSpec((K, E), lambda i: (0, 0)),    # resident (constant block idx)
                pl.BlockSpec((1, E), lambda i: (0, 0)),    # resident
            ],
            out_specs=pl.BlockSpec((TM, E), lambda i: (i, 0)),
        ),
        compiler_params=pltpu.CompilerParams(
            dimension_semantics=("parallel",),             # megacore sharding on v7x
        ),
    )(patches, weight_2d, bias_2d)


def patch_embed_forward(x, conv_weight, conv_bias, patch_size=4,
                        compute_dtype=jnp.bfloat16, tm=2048):
    """x: (B, C, H, W) NCHW; conv_weight: (E, C, ph, pw); conv_bias: (E,).

    Returns (out, Hp, Wp) with out: (B, Hp*Wp, E) in x.dtype (f32 accumulation).
    """
    B, C, H, W = x.shape
    ph = pw = patch_size
    embed_dim = conv_weight.shape[0]
    out_dtype = x.dtype

    # Cast to bf16 BEFORE building the (M, K) intermediate so the extra
    # XLA reshape/transpose pass over HBM is half the bytes.
    xc = x.astype(compute_dtype)

    # F.pad(x, (0, pad_w, 0, pad_h, 0, 0)) — pad right/bottom with zeros.
    pad_h = (-H) % ph
    pad_w = (-W) % pw
    if pad_h or pad_w:
        xc = jnp.pad(xc, ((0, 0), (0, 0), (0, pad_h), (0, pad_w)))
    H2, W2 = H + pad_h, W + pad_w
    Hp, Wp = H2 // ph, W2 // pw

    # Extract non-overlapping patches:
    # (B,C,Hp,ph,Wp,pw) -> (B,Hp,Wp,C,ph,pw) -> (B*Hp*Wp, C*ph*pw)
    # TODO(synk): fold patch extraction into the kernel (grid over (B,Hp) with
    # a 6-D BlockSpec) so the (M,K) intermediate is never written to HBM.
    patches = (
        xc.reshape(B, C, Hp, ph, Wp, pw)
        .transpose(0, 2, 4, 1, 3, 5)
        .reshape(B * Hp * Wp, C * ph * pw)
    )

    # Conv weight (E, C, ph, pw) -> (C*ph*pw, E); matches patch flattening order.
    w2d = conv_weight.reshape(embed_dim, C * ph * pw).T.astype(compute_dtype)
    b2d = conv_bias.reshape(1, embed_dim).astype(jnp.float32)

    out = _patch_proj(patches, w2d, b2d, out_dtype=out_dtype, tm=tm)
    out = out.reshape(B, Hp * Wp, embed_dim)      # == flatten(2).transpose(1,2)
    # norm_layer=None -> Identity
    return out, Hp, Wp


def _reference(x, conv_weight, conv_bias, patch_size):
    """Pure-JAX f32 reference (patch-extraction matmul == stride=kernel conv)."""
    B, C, H, W = x.shape
    ph = pw = patch_size
    E = conv_weight.shape[0]
    pad_h = (-H) % ph
    pad_w = (-W) % pw
    xp = jnp.pad(x, ((0, 0), (0, 0), (0, pad_h), (0, pad_w)))
    Hp, Wp = (H + pad_h) // ph, (W + pad_w) // pw
    patches = (
        xp.reshape(B, C, Hp, ph, Wp, pw)
        .transpose(0, 2, 4, 1, 3, 5)
        .reshape(B * Hp * Wp, C * ph * pw)
    )
    ref = patches @ conv_weight.reshape(E, -1).T + conv_bias
    return ref.reshape(B, Hp * Wp, E), Hp, Wp


if __name__ == "__main__":
    patch_size = 4
    in_c = 3
    embed_dim = 96
    B = 2

    key = jax.random.PRNGKey(0)
    kx, kw, kb, kx2 = jax.random.split(key, 4)
    conv_weight = (
        jax.random.normal(kw, (embed_dim, in_c, patch_size, patch_size), dtype=jnp.float32)
        * 0.02
    )
    conv_bias = jax.random.normal(kb, (embed_dim,), dtype=jnp.float32) * 0.02

    fwd = jax.jit(functools.partial(patch_embed_forward, patch_size=patch_size))

    # Case 1: divisible spatial dims (no padding path).
    x = jax.random.normal(kx, (B, in_c, 16, 16), dtype=jnp.float32)
    out, Hp, Wp = fwd(x, conv_weight, conv_bias)
    out = jax.block_until_ready(out)
    ref, Hp_r, Wp_r = _reference(x, conv_weight, conv_bias, patch_size)
    assert out.shape == (B, Hp_r * Wp_r, embed_dim)
    assert (Hp, Wp) == (Hp_r, Wp_r) == (4, 4)
    # bf16 inputs with f32 accumulation -> loosened tolerance vs f32 reference.
    assert jnp.allclose(out, ref, atol=1e-2, rtol=1e-2), float(jnp.max(jnp.abs(out - ref)))

    # Case 2: non-divisible spatial dims (exercises the zero-padding path).
    x2 = jax.random.normal(kx2, (B, in_c, 14, 14), dtype=jnp.float32)
    out2, Hp2, Wp2 = fwd(x2, conv_weight, conv_bias)
    out2 = jax.block_until_ready(out2)
    ref2, Hp2_r, Wp2_r = _reference(x2, conv_weight, conv_bias, patch_size)
    assert out2.shape == (B, Hp2_r * Wp2_r, embed_dim)
    assert (Hp2, Wp2) == (Hp2_r, Wp2_r) == (4, 4)
    assert jnp.allclose(out2, ref2, atol=1e-2, rtol=1e-2), float(jnp.max(jnp.abs(out2 - ref2)))

    print("KERNEL_OK")
</pallas_src>

<mosaic_0001>
module attributes {stable_mosaic.version = 11 : i64} {
  func.func @_patch_proj_kernel(%arg0: i32, %arg1: memref<32x48xbf16, #tpu.memory_space<vmem>>, %arg2: memref<48x96xbf16, #tpu.memory_space<vmem>>, %arg3: memref<1x96xf32, #tpu.memory_space<vmem>>, %arg4: memref<32x96xf32, #tpu.memory_space<vmem>>) attributes {dimension_semantics = [#tpu.dimension_semantics<parallel>], iteration_bounds = array<i64: 1>, scalar_prefetch = 0 : i64, scratch_operands = 0 : i64, tpu.core_type = #tpu.core_type<tc>, window_params = [{transform_indices = @transform_0, window_bounds = array<i64: 32, 48>}, {pipeline_mode = #tpu.pipeline_mode<synchronous>, transform_indices = @transform_1, window_bounds = array<i64: 48, 96>}, {pipeline_mode = #tpu.pipeline_mode<synchronous>, transform_indices = @transform_2, window_bounds = array<i64: 1, 96>}, {transform_indices = @transform_3, window_bounds = array<i64: 32, 96>}]} {
    %c0 = arith.constant 0 : index
    %c0_0 = arith.constant 0 : index
    %0 = vector.load %arg1[%c0, %c0_0] : memref<32x48xbf16, #tpu.memory_space<vmem>>, vector<32x48xbf16>
    %c0_1 = arith.constant 0 : index
    %c0_2 = arith.constant 0 : index
    %1 = vector.load %arg2[%c0_1, %c0_2] : memref<48x96xbf16, #tpu.memory_space<vmem>>, vector<48x96xbf16>
    %cst = arith.constant dense<0.000000e+00> : vector<32x96xf32>
    %2 = tpu.matmul %0, %1, %cst {dimension_numbers = #tpu.dot_dimension_numbers<[1], [0], [0], [1], [0, 0, 1, 1], [], []>} : vector<32x48xbf16>, vector<48x96xbf16>, vector<32x96xf32> -> vector<32x96xf32>
    %c0_3 = arith.constant 0 : index
    %c0_4 = arith.constant 0 : index
    %3 = vector.load %arg3[%c0_3, %c0_4] : memref<1x96xf32, #tpu.memory_space<vmem>>, vector<1x96xf32>
    %4 = vector.broadcast %3 : vector<1x96xf32> to vector<32x96xf32>
    %5 = arith.addf %2, %4 : vector<32x96xf32>
    %c0_5 = arith.constant 0 : index
    %c0_6 = arith.constant 0 : index
    %6 = vector.load %arg4[%c0_5, %c0_6] : memref<32x96xf32, #tpu.memory_space<vmem>>, vector<32x96xf32>
    tpu.vector_store %arg4[%c0_5, %c0_6], %5 {strides = array<i32>} : memref<32x96xf32, #tpu.memory_space<vmem>>, vector<32x96xf32>,
    return
  }
  func.func @transform_0(%arg0: i32) -> (i32, i32) {
    %c0_i32 = arith.constant 0 : i32
    %c0_i32_0 = arith.constant 0 : i32
    return %arg0, %c0_i32 : i32, i32
  }
  func.func @transform_1(%arg0: i32) -> (i32, i32) {
    %c0_i32 = arith.constant 0 : i32
    %c0_i32_0 = arith.constant 0 : i32
    %c0_i32_1 = arith.constant 0 : i32
    return %c0_i32, %c0_i32_0 : i32, i32
  }
  func.func @transform_2(%arg0: i32) -> (i32, i32) {
    %c0_i32 = arith.constant 0 : i32
    %c0_i32_0 = arith.constant 0 : i32
    %c0_i32_1 = arith.constant 0 : i32
    return %c0_i32, %c0_i32_0 : i32, i32
  }
  func.func @transform_3(%arg0: i32) -> (i32, i32) {
    %c0_i32 = arith.constant 0 : i32
    %c0_i32_0 = arith.constant 0 : i32
    return %arg0, %c0_i32 : i32, i32
  }
}

</mosaic_0001>

<bundles_post_ra>
// kernel: patch_embed_forward.1
= control target key start
LH: loop header
LB: loop body
LE: loop exit
PB: predicated region body
PF: predicated region fallthrough
CT: control target
= control target key end

     0   :  { %s215_s0 = inlined_call_operand.vmem [shape: bf16[32,48], index: 0, kind: input, shape index: {}]   ;;  %s216_s1 = inlined_call_operand.vmem [shape: bf16[48,96], index: 1, kind: input, shape index: {}]   ;;  %s217_s2 = inlined_call_operand.vmem [shape: f32[1,96], index: 2, kind: input, shape index: {}]   ;;  %s218_s3 = inlined_call_operand.hbm [shape: f32[32,96], index: 3, kind: output, shape index: {}]  }
   0x1   :  { %v133_v0 = vld [vmem:[%s216_s1 + $0x10] sm:$0xff]  ;;  %v132_v1 = vld [vmem:[%s216_s1 + $0x8] sm:$0xff] }
   0x2   :  { %70 = vmatpush.bf16.msra.mxu0 %v133_v0  ;;  %134 = vmatpush.bf16.msra.mxu1 %v133_v0 }
   0x3   :  { %8 = vsyncpa [#allocation3], 0  ;;  %v131_v2 = vld [vmem:[%s216_s1] sm:$0xff]  ;;  %v130_v4 = vld [vmem:[%s215_s0 + $0x8] sm:$0xff]  ;;  %vm58_vm0 = vcmask 392192   ;;  %vm84_vm1 = vcmask 785408  }
   0x4   :  { %v129_v3 = vld [vmem:[%s215_s0] sm:$0xff]  ;;  %s167_s1 = smov [#allocation2]   ;;  %s95_s26 = sshll.u32 %s218_s3, 4  ;;  %s96_s26 = int_to_ptr.hbm [resolvable:$true] %s95_s26 }
   0x5   :  { %v140_v5 = vld [vmem:[%s217_s2] ss:$0 sm:$0xff]  ;;  %s93_s0 = sshll.u32 %s167_s1, 4  ;;  %s168_s2 = smov 128   ;;  %s94_s0 = int_to_ptr.vmem [resolvable:$true] %s93_s0 }
   0x6   :  { %71 = vmatpush.bf16.msra.mxu0 %v132_v1  ;;  %135 = vmatpush.bf16.msra.mxu1 %v132_v1  ;;  %s169_s27 = smov 8  }
   0xa   :  { %72 = vmatpush.bf16.msra.mxu0 %v131_v2  ;;  %136 = vmatpush.bf16.msra.mxu1 %v131_v2 }
   0xd   :  { %127 = vmatmul.msk.bf16.vlgmr.msra.gmra.mxu0 %vm58_vm0, %v129_v3  ;;  %128 = vmatmul.msk.bf16.vlgmr.msra.gmra.mxu1 %vm58_vm0, %v130_v4 }
  0x8a   :  { %v74_v6 = vpop.f32.mrf.mxu0  ;;  %v79_v7 = vpop.f32.mrf.mxu1 }
  0x8b   :  { %v75_v8 = vadd.f32 %v140_v5, %v74_v6  ;;  %v80_v9 = vadd.f32 %v140_v5, %v79_v7 }
  0x8d   :  { %85 = vst.msk [vmem:[#allocation2] sm:$0xff] %vm84_vm1, %v75_v8 }
  0x8e   :  { %87 = vst.msk [vmem:[#allocation2 + $0x10] sm:$0xff] %vm84_vm1, %v80_v9 }
  0x92   :  { %v76_v10 = vpop.f32.mrf.mxu0  ;;  %v81_v11 = vpop.f32.mrf.mxu1 }
  0x93   :  { %v77_v12 = vadd.f32 %v140_v5, %v76_v10  ;;  %v82_v13 = vadd.f32 %v140_v5, %v81_v11 }
  0x95   :  { %86 = vst.msk [vmem:[#allocation2 + $0x8] sm:$0xff] %vm84_vm1, %v77_v12 }
  0x96   :  { %88 = vst.msk [vmem:[#allocation2 + $0x18] sm:$0xff] %vm84_vm1, %v82_v13 }
  0x97   :  { %101 = dma.vmem_to_hbm [thread:$0]  %s94_s0, 512, %s96_s26, [#allocation3], %s168_s2, %s168_s2, %s169_s27  }
  0x98   :  { %165 = dma.done.wait [#allocation3], 512  }
  0x99   :  { %166 = vsyncadd [#allocation3], 4294966784 }
  0x9a   :  { %106 = vsyncpa [#allocation3], 1 }

</bundles_post_ra>
